<compile_context>
chip_gen: v6e
topology: v6e:2x2x1
jax: 0.10.0
libtpu: 0.0.40
codegen_flags: <defaults>
</compile_context>

<pallas_src>
import functools

import jax
import jax.numpy as jnp
from jax import lax
from jax.experimental import pallas as pl
from jax.experimental.pallas import tpu as pltpu

BN_EPS = 1e-3      # matches nn.BatchNorm2d(out_channels, eps=0.001)
LANE = 128


def _round_up(x, m):
    return (x + m - 1) // m * m


# --------------------- kernel 1: direct conv + fused BN partial stats ---------------------

def _conv_stats_kernel(x_ref, w_ref, y_ref, stats_ref, *,
                       th, ho_total, wo, kh, kw, cout_p, stride):
    """One (batch, output-row-tile) grid step.

    x_ref:     (Hp, Wp, Cin)         padded input image of this batch element
    w_ref:     (KH*KW, Cin, Cout_p)  conv weights, output channels zero-padded to 128
    y_ref:     (th, Wo, Cout_p)      conv output rows for this tile (lane-dense)
    stats_ref: (8, Cout_p)           row0 = sum(y), row1 = sum(y*y) over this tile
    """
    hb = pl.program_id(1)
    ho0 = hb * th

    def row_body(r, carry):
        psum, pssq = carry
        ho = ho0 + r
        # Clamp so a ragged last row-tile never reads out of bounds; its output
        # rows are discarded by Pallas and its stats are masked out below.
        ho_c = jnp.minimum(ho, ho_total - 1)
        acc = jnp.zeros((wo, cout_p), jnp.float32)
        for i in range(kh):
            row = ho_c * stride + i
            for j in range(kw):
                if stride == 1:
                    xs = x_ref[row, pl.ds(j, wo)]                      # (Wo, Cin)
                else:
                    xs = x_ref[row, pl.ds(j, wo, stride=stride)]       # (Wo, Cin)
                acc = acc + jnp.dot(xs, w_ref[i * kw + j],
                                    preferred_element_type=jnp.float32)
        y_ref[r] = acc
        valid = (ho < ho_total).astype(jnp.float32)
        psum = psum + valid * jnp.sum(acc, axis=0, keepdims=True)
        pssq = pssq + valid * jnp.sum(acc * acc, axis=0, keepdims=True)
        return psum, pssq

    zeros = jnp.zeros((1, cout_p), jnp.float32)
    psum, pssq = lax.fori_loop(0, th, row_body, (zeros, zeros))

    stats_ref[0:1, :] = psum
    stats_ref[1:2, :] = pssq
    stats_ref[2:8, :] = jnp.zeros((6, cout_p), jnp.float32)


# --------------------------- kernel 2: tiled normalize + ReLU ---------------------------

def _bn_relu_kernel(y_ref, s_ref, b_ref, o_ref):
    # out = relu(y * scale + shift), scale/shift are per-channel (lane-dense 128).
    o_ref[...] = jnp.maximum(y_ref[...] * s_ref[...] + b_ref[...], 0.0)


# ------------------------------------ wrapper (JAX) ------------------------------------

def basic_conv2d(x_nchw, weight_oihw, gamma, beta, *, stride=1, padding=1):
    """Forward of BasicConv2d.  x: (N, Cin, H, W) f32, weight: (Cout, Cin, KH, KW)."""
    N, Cin, H, W = x_nchw.shape
    Cout, _, KH, KW = weight_oihw.shape
    Ho = (H + 2 * padding - KH) // stride + 1
    Wo = (W + 2 * padding - KW) // stride + 1
    Hp, Wp = H + 2 * padding, W + 2 * padding
    Cout_p = _round_up(Cout, LANE)          # lane-dense output channels
    M = N * Ho * Wo

    x_nhwc = jnp.transpose(x_nchw, (0, 2, 3, 1)).astype(jnp.float32)
    xp = jnp.pad(x_nhwc, ((0, 0), (padding, padding), (padding, padding), (0, 0)))

    # (Cout, Cin, KH, KW) -> (KH*KW, Cin, Cout_p), padded channels are zero.
    w = jnp.transpose(weight_oihw, (2, 3, 1, 0)).astype(jnp.float32)
    w = w.reshape(KH * KW, Cin, Cout)
    w = jnp.pad(w, ((0, 0), (0, 0), (0, Cout_p - Cout)))

    TH = min(8, Ho)                          # output rows per grid step
    HB = -(-Ho // TH)

    kern1 = functools.partial(_conv_stats_kernel, th=TH, ho_total=Ho, wo=Wo,
                              kh=KH, kw=KW, cout_p=Cout_p, stride=stride)

    conv_bytes = int((xp.size + w.size) * 4
                     + (N * Ho * Wo * Cout_p + N * HB * 8 * Cout_p) * 4)
    y, stats = pl.pallas_call(
        kern1,
        out_shape=(jax.ShapeDtypeStruct((N, Ho, Wo, Cout_p), jnp.float32),
                   jax.ShapeDtypeStruct((N, HB, 8, Cout_p), jnp.float32)),
        grid=(N, HB),
        in_specs=[
            pl.BlockSpec((None, Hp, Wp, Cin), lambda n, hb: (n, 0, 0, 0)),
            pl.BlockSpec((KH * KW, Cin, Cout_p), lambda n, hb: (0, 0, 0)),
        ],
        out_specs=(
            pl.BlockSpec((None, TH, Wo, Cout_p), lambda n, hb: (n, hb, 0, 0)),
            pl.BlockSpec((None, None, 8, Cout_p), lambda n, hb: (n, hb, 0, 0)),
        ),
        compiler_params=pltpu.CompilerParams(
            dimension_semantics=("parallel", "parallel"),
            vmem_limit_bytes=32 * 1024 * 1024),
        cost_estimate=pl.CostEstimate(
            flops=2 * M * KH * KW * Cin * Cout_p,
            transcendentals=0,
            bytes_accessed=conv_bytes),
    )(xp, w)

    # ---- BN statistics from the fused per-tile partials (tiny per-channel XLA ops) ----
    tot_sum = jnp.sum(stats[:, :, 0, :], axis=(0, 1))            # (Cout_p,)
    tot_ssq = jnp.sum(stats[:, :, 1, :], axis=(0, 1))
    mean = tot_sum / M
    var = jnp.maximum(tot_ssq / M - mean * mean, 0.0)             # biased (training) var
    inv = lax.rsqrt(var + BN_EPS)
    gamma_p = jnp.pad(gamma.astype(jnp.float32), (0, Cout_p - Cout))
    beta_p = jnp.pad(beta.astype(jnp.float32), (0, Cout_p - Cout))
    scale = (gamma_p * inv).reshape(1, Cout_p)
    shift = (beta_p - mean * gamma_p * inv).reshape(1, Cout_p)

    # ---- kernel 2: tiled normalize + ReLU over the flattened (M, Cout_p) slab ----
    y2 = y.reshape(M, Cout_p)
    if M >= 1024:
        tm2 = 512
    elif M >= 16:
        tm2 = max(8, (M // 2) // 8 * 8)
    else:
        tm2 = M
    grid_m = -(-M // tm2)

    out2 = pl.pallas_call(
        _bn_relu_kernel,
        out_shape=jax.ShapeDtypeStruct((M, Cout_p), jnp.float32),
        grid=(grid_m,),
        in_specs=[
            pl.BlockSpec((tm2, Cout_p), lambda i: (i, 0)),
            pl.BlockSpec((1, Cout_p), lambda i: (0, 0)),
            pl.BlockSpec((1, Cout_p), lambda i: (0, 0)),
        ],
        out_specs=pl.BlockSpec((tm2, Cout_p), lambda i: (i, 0)),
        compiler_params=pltpu.CompilerParams(
            dimension_semantics=("parallel",),
            vmem_limit_bytes=32 * 1024 * 1024),
        cost_estimate=pl.CostEstimate(
            flops=2 * M * Cout_p,
            transcendentals=0,
            bytes_accessed=int(2 * M * Cout_p * 4)),
    )(y2, scale, shift)

    out = out2.reshape(N, Ho, Wo, Cout_p)[..., :Cout]
    return jnp.transpose(out, (0, 3, 1, 2))


# --------------------------------- pure-JAX reference ---------------------------------

def _reference(x, w, gamma, beta, *, stride=1, padding=1):
    y = lax.conv_general_dilated(
        x, w, (stride, stride), [(padding, padding), (padding, padding)],
        dimension_numbers=("NCHW", "OIHW", "NCHW"),
        precision=lax.Precision.HIGHEST)
    mean = y.mean(axis=(0, 2, 3), keepdims=True)
    var = ((y - mean) ** 2).mean(axis=(0, 2, 3), keepdims=True)   # biased (training BN)
    yn = (y - mean) * lax.rsqrt(var + BN_EPS)
    yn = yn * gamma.reshape(1, -1, 1, 1) + beta.reshape(1, -1, 1, 1)
    return jnp.maximum(yn, 0.0)


if __name__ == "__main__":
    # BasicConv2d(in_channels=4, out_channels=8, kernel_size=3, padding=1)
    N, Cin, H, W = 2, 4, 16, 16
    Cout, KH, KW = 8, 3, 3

    key = jax.random.PRNGKey(0)
    kx, kw, kg, kb = jax.random.split(key, 4)
    x = jax.random.normal(kx, (N, Cin, H, W), dtype=jnp.float32)
    weight = jax.random.normal(kw, (Cout, Cin, KH, KW), dtype=jnp.float32) * 0.1
    gamma = 1.0 + 0.1 * jax.random.normal(kg, (Cout,), dtype=jnp.float32)
    beta = 0.1 * jax.random.normal(kb, (Cout,), dtype=jnp.float32)

    out = basic_conv2d(x, weight, gamma, beta, stride=1, padding=1)
    out = jax.block_until_ready(out)

    ref = _reference(x, weight, gamma, beta, stride=1, padding=1)
    assert out.shape == (N, Cout, H, W)
    assert jnp.allclose(out, ref, atol=1e-4, rtol=1e-4)

    print("KERNEL_OK")
</pallas_src>

<mosaic_0001>
module attributes {stable_mosaic.version = 11 : i64} {
  func.func @_conv_stats_kernel(%arg0: i32, %arg1: i32, %arg2: memref<1x18x18x4xf32, #tpu.memory_space<vmem>>, %arg3: memref<9x4x128xf32, #tpu.memory_space<vmem>>, %arg4: memref<1x8x16x128xf32, #tpu.memory_space<vmem>>, %arg5: memref<1x1x8x128xf32, #tpu.memory_space<vmem>>) attributes {dimension_semantics = [#tpu.dimension_semantics<parallel>, #tpu.dimension_semantics<parallel>], iteration_bounds = array<i64: 2, 2>, scalar_prefetch = 0 : i64, scratch_operands = 0 : i64, tpu.core_type = #tpu.core_type<tc>, window_params = [{transform_indices = @transform_0, window_bounds = array<i64: 1, 18, 18, 4>}, {pipeline_mode = #tpu.pipeline_mode<synchronous>, transform_indices = @transform_1, window_bounds = array<i64: 9, 4, 128>}, {transform_indices = @transform_2, window_bounds = array<i64: 1, 8, 16, 128>}, {transform_indices = @transform_3, window_bounds = array<i64: 1, 1, 8, 128>}]} {
    %c8_i32 = arith.constant 8 : i32
    %0 = arith.muli %arg1, %c8_i32 : i32
    %cst = arith.constant 0.000000e+00 : f32
    %1 = vector.broadcast %cst : f32 to vector<1x128xf32>
    %c0_i32 = arith.constant 0 : i32
    %c8_i32_0 = arith.constant 8 : i32
    %2 = arith.addi %c0_i32, %c8_i32_0 : i32
    %c1_i32 = arith.constant 1 : i32
    %3:2 = scf.for %arg6 = %c0_i32 to %2 step %c1_i32 iter_args(%arg7 = %1, %arg8 = %1) -> (vector<1x128xf32>, vector<1x128xf32>)  : i32 {
      %14 = arith.addi %0, %arg6 : i32
      %c15_i32 = arith.constant 15 : i32
      %15 = arith.minsi %14, %c15_i32 : i32
      %cst_12 = arith.constant 0.000000e+00 : f32
      %16 = vector.broadcast %cst_12 : f32 to vector<16x128xf32>
      %c1_i32_13 = arith.constant 1 : i32
      %17 = arith.muli %15, %c1_i32_13 : i32
      %c0_i32_14 = arith.constant 0 : i32
      %18 = arith.addi %17, %c0_i32_14 : i32
      %c0_15 = arith.constant 0 : index
      %19 = arith.index_cast %18 : i32 to index
      %c0_16 = arith.constant 0 : index
      %c0_17 = arith.constant 0 : index
      %20 = vector.load %arg2[%c0_15, %19, %c0_16, %c0_17] : memref<1x18x18x4xf32, #tpu.memory_space<vmem>>, vector<1x1x16x4xf32>
      %21 = vector.shape_cast %20 : vector<1x1x16x4xf32> to vector<16x4xf32>
      %c0_18 = arith.constant 0 : index
      %c0_19 = arith.constant 0 : index
      %c0_20 = arith.constant 0 : index
      %22 = vector.load %arg3[%c0_18, %c0_19, %c0_20] : memref<9x4x128xf32, #tpu.memory_space<vmem>>, vector<1x4x128xf32>
      %23 = vector.shape_cast %22 : vector<1x4x128xf32> to vector<4x128xf32>
      %cst_21 = arith.constant dense<0.000000e+00> : vector<16x128xf32>
      %24 = tpu.matmul %21, %23, %cst_21 {dimension_numbers = #tpu.dot_dimension_numbers<[1], [0], [0], [1], [0, 0, 1, 1], [], []>} : vector<16x4xf32>, vector<4x128xf32>, vector<16x128xf32> -> vector<16x128xf32>
      %25 = arith.addf %16, %24 : vector<16x128xf32>
      %c0_22 = arith.constant 0 : index
      %26 = arith.index_cast %18 : i32 to index
      %c1_23 = arith.constant 1 : index
      %c0_24 = arith.constant 0 : index
      %27 = vector.load %arg2[%c0_22, %26, %c1_23, %c0_24] : memref<1x18x18x4xf32, #tpu.memory_space<vmem>>, vector<1x1x16x4xf32>
      %28 = vector.shape_cast %27 : vector<1x1x16x4xf32> to vector<16x4xf32>
      %c1_25 = arith.constant 1 : index
      %c0_26 = arith.constant 0 : index
      %c0_27 = arith.constant 0 : index
      %29 = vector.load %arg3[%c1_25, %c0_26, %c0_27] : memref<9x4x128xf32, #tpu.memory_space<vmem>>, vector<1x4x128xf32>
      %30 = vector.shape_cast %29 : vector<1x4x128xf32> to vector<4x128xf32>
      %cst_28 = arith.constant dense<0.000000e+00> : vector<16x128xf32>
      %31 = tpu.matmul %28, %30, %cst_28 {dimension_numbers = #tpu.dot_dimension_numbers<[1], [0], [0], [1], [0, 0, 1, 1], [], []>} : vector<16x4xf32>, vector<4x128xf32>, vector<16x128xf32> -> vector<16x128xf32>
      %32 = arith.addf %25, %31 : vector<16x128xf32>
      %c0_29 = arith.constant 0 : index
      %33 = arith.index_cast %18 : i32 to index
      %c2_30 = arith.constant 2 : index
      %c0_31 = arith.constant 0 : index
      %34 = vector.load %arg2[%c0_29, %33, %c2_30, %c0_31] : memref<1x18x18x4xf32, #tpu.memory_space<vmem>>, vector<1x1x16x4xf32>
      %35 = vector.shape_cast %34 : vector<1x1x16x4xf32> to vector<16x4xf32>
      %c2_32 = arith.constant 2 : index
      %c0_33 = arith.constant 0 : index
      %c0_34 = arith.constant 0 : index
      %36 = vector.load %arg3[%c2_32, %c0_33, %c0_34] : memref<9x4x128xf32, #tpu.memory_space<vmem>>, vector<1x4x128xf32>
      %37 = vector.shape_cast %36 : vector<1x4x128xf32> to vector<4x128xf32>
      %cst_35 = arith.constant dense<0.000000e+00> : vector<16x128xf32>
      %38 = tpu.matmul %35, %37, %cst_35 {dimension_numbers = #tpu.dot_dimension_numbers<[1], [0], [0], [1], [0, 0, 1, 1], [], []>} : vector<16x4xf32>, vector<4x128xf32>, vector<16x128xf32> -> vector<16x128xf32>
      %39 = arith.addf %32, %38 : vector<16x128xf32>
      %c1_i32_36 = arith.constant 1 : i32
      %40 = arith.muli %15, %c1_i32_36 : i32
      %c1_i32_37 = arith.constant 1 : i32
      %41 = arith.addi %40, %c1_i32_37 : i32
      %c0_38 = arith.constant 0 : index
      %42 = arith.index_cast %41 : i32 to index
      %c0_39 = arith.constant 0 : index
      %c0_40 = arith.constant 0 : index
      %43 = vector.load %arg2[%c0_38, %42, %c0_39, %c0_40] : memref<1x18x18x4xf32, #tpu.memory_space<vmem>>, vector<1x1x16x4xf32>
      %44 = vector.shape_cast %43 : vector<1x1x16x4xf32> to vector<16x4xf32>
      %c3 = arith.constant 3 : index
      %c0_41 = arith.constant 0 : index
      %c0_42 = arith.constant 0 : index
      %45 = vector.load %arg3[%c3, %c0_41, %c0_42] : memref<9x4x128xf32, #tpu.memory_space<vmem>>, vector<1x4x128xf32>
      %46 = vector.shape_cast %45 : vector<1x4x128xf32> to vector<4x128xf32>
      %cst_43 = arith.constant dense<0.000000e+00> : vector<16x128xf32>
      %47 = tpu.matmul %44, %46, %cst_43 {dimension_numbers = #tpu.dot_dimension_numbers<[1], [0], [0], [1], [0, 0, 1, 1], [], []>} : vector<16x4xf32>, vector<4x128xf32>, vector<16x128xf32> -> vector<16x128xf32>
      %48 = arith.addf %39, %47 : vector<16x128xf32>
      %c0_44 = arith.constant 0 : index
      %49 = arith.index_cast %41 : i32 to index
      %c1_45 = arith.constant 1 : index
      %c0_46 = arith.constant 0 : index
      %50 = vector.load %arg2[%c0_44, %49, %c1_45, %c0_46] : memref<1x18x18x4xf32, #tpu.memory_space<vmem>>, vector<1x1x16x4xf32>
      %51 = vector.shape_cast %50 : vector<1x1x16x4xf32> to vector<16x4xf32>
      %c4 = arith.constant 4 : index
      %c0_47 = arith.constant 0 : index
      %c0_48 = arith.constant 0 : index
      %52 = vector.load %arg3[%c4, %c0_47, %c0_48] : memref<9x4x128xf32, #tpu.memory_space<vmem>>, vector<1x4x128xf32>
      %53 = vector.shape_cast %52 : vector<1x4x128xf32> to vector<4x128xf32>
      %cst_49 = arith.constant dense<0.000000e+00> : vector<16x128xf32>
      %54 = tpu.matmul %51, %53, %cst_49 {dimension_numbers = #tpu.dot_dimension_numbers<[1], [0], [0], [1], [0, 0, 1, 1], [], []>} : vector<16x4xf32>, vector<4x128xf32>, vector<16x128xf32> -> vector<16x128xf32>
      %55 = arith.addf %48, %54 : vector<16x128xf32>
      %c0_50 = arith.constant 0 : index
      %56 = arith.index_cast %41 : i32 to index
      %c2_51 = arith.constant 2 : index
      %c0_52 = arith.constant 0 : index
      %57 = vector.load %arg2[%c0_50, %56, %c2_51, %c0_52] : memref<1x18x18x4xf32, #tpu.memory_space<vmem>>, vector<1x1x16x4xf32>
      %58 = vector.shape_cast %57 : vector<1x1x16x4xf32> to vector<16x4xf32>
      %c5 = arith.constant 5 : index
      %c0_53 = arith.constant 0 : index
      %c0_54 = arith.constant 0 : index
      %59 = vector.load %arg3[%c5, %c0_53, %c0_54] : memref<9x4x128xf32, #tpu.memory_space<vmem>>, vector<1x4x128xf32>
      %60 = vector.shape_cast %59 : vector<1x4x128xf32> to vector<4x128xf32>
      %cst_55 = arith.constant dense<0.000000e+00> : vector<16x128xf32>
      %61 = tpu.matmul %58, %60, %cst_55 {dimension_numbers = #tpu.dot_dimension_numbers<[1], [0], [0], [1], [0, 0, 1, 1], [], []>} : vector<16x4xf32>, vector<4x128xf32>, vector<16x128xf32> -> vector<16x128xf32>
      %62 = arith.addf %55, %61 : vector<16x128xf32>
      %c1_i32_56 = arith.constant 1 : i32
      %63 = arith.muli %15, %c1_i32_56 : i32
      %c2_i32 = arith.constant 2 : i32
      %64 = arith.addi %63, %c2_i32 : i32
      %c0_57 = arith.constant 0 : index
      %65 = arith.index_cast %64 : i32 to index
      %c0_58 = arith.constant 0 : index
      %c0_59 = arith.constant 0 : index
      %66 = vector.load %arg2[%c0_57, %65, %c0_58, %c0_59] : memref<1x18x18x4xf32, #tpu.memory_space<vmem>>, vector<1x1x16x4xf32>
      %67 = vector.shape_cast %66 : vector<1x1x16x4xf32> to vector<16x4xf32>
      %c6 = arith.constant 6 : index
      %c0_60 = arith.constant 0 : index
      %c0_61 = arith.constant 0 : index
      %68 = vector.load %arg3[%c6, %c0_60, %c0_61] : memref<9x4x128xf32, #tpu.memory_space<vmem>>, vector<1x4x128xf32>
      %69 = vector.shape_cast %68 : vector<1x4x128xf32> to vector<4x128xf32>
      %cst_62 = arith.constant dense<0.000000e+00> : vector<16x128xf32>
      %70 = tpu.matmul %67, %69, %cst_62 {dimension_numbers = #tpu.dot_dimension_numbers<[1], [0], [0], [1], [0, 0, 1, 1], [], []>} : vector<16x4xf32>, vector<4x128xf32>, vector<16x128xf32> -> vector<16x128xf32>
      %71 = arith.addf %62, %70 : vector<16x128xf32>
      %c0_63 = arith.constant 0 : index
      %72 = arith.index_cast %64 : i32 to index
      %c1_64 = arith.constant 1 : index
      %c0_65 = arith.constant 0 : index
      %73 = vector.load %arg2[%c0_63, %72, %c1_64, %c0_65] : memref<1x18x18x4xf32, #tpu.memory_space<vmem>>, vector<1x1x16x4xf32>
      %74 = vector.shape_cast %73 : vector<1x1x16x4xf32> to vector<16x4xf32>
      %c7 = arith.constant 7 : index
      %c0_66 = arith.constant 0 : index
      %c0_67 = arith.constant 0 : index
      %75 = vector.load %arg3[%c7, %c0_66, %c0_67] : memref<9x4x128xf32, #tpu.memory_space<vmem>>, vector<1x4x128xf32>
      %76 = vector.shape_cast %75 : vector<1x4x128xf32> to vector<4x128xf32>
      %cst_68 = arith.constant dense<0.000000e+00> : vector<16x128xf32>
      %77 = tpu.matmul %74, %76, %cst_68 {dimension_numbers = #tpu.dot_dimension_numbers<[1], [0], [0], [1], [0, 0, 1, 1], [], []>} : vector<16x4xf32>, vector<4x128xf32>, vector<16x128xf32> -> vector<16x128xf32>
      %78 = arith.addf %71, %77 : vector<16x128xf32>
      %c0_69 = arith.constant 0 : index
      %79 = arith.index_cast %64 : i32 to index
      %c2_70 = arith.constant 2 : index
      %c0_71 = arith.constant 0 : index
      %80 = vector.load %arg2[%c0_69, %79, %c2_70, %c0_71] : memref<1x18x18x4xf32, #tpu.memory_space<vmem>>, vector<1x1x16x4xf32>
      %81 = vector.shape_cast %80 : vector<1x1x16x4xf32> to vector<16x4xf32>
      %c8 = arith.constant 8 : index
      %c0_72 = arith.constant 0 : index
      %c0_73 = arith.constant 0 : index
      %82 = vector.load %arg3[%c8, %c0_72, %c0_73] : memref<9x4x128xf32, #tpu.memory_space<vmem>>, vector<1x4x128xf32>
      %83 = vector.shape_cast %82 : vector<1x4x128xf32> to vector<4x128xf32>
      %cst_74 = arith.constant dense<0.000000e+00> : vector<16x128xf32>
      %84 = tpu.matmul %81, %83, %cst_74 {dimension_numbers = #tpu.dot_dimension_numbers<[1], [0], [0], [1], [0, 0, 1, 1], [], []>} : vector<16x4xf32>, vector<4x128xf32>, vector<16x128xf32> -> vector<16x128xf32>
      %85 = arith.addf %78, %84 : vector<16x128xf32>
      %c0_75 = arith.constant 0 : index
      %86 = arith.index_cast %arg6 : i32 to index
      %c0_76 = arith.constant 0 : index
      %c0_77 = arith.constant 0 : index
      %87 = vector.load %arg4[%c0_75, %86, %c0_76, %c0_77] : memref<1x8x16x128xf32, #tpu.memory_space<vmem>>, vector<1x1x16x128xf32>
      %88 = vector.shape_cast %87 : vector<1x1x16x128xf32> to vector<16x128xf32>
      %89 = vector.shape_cast %85 : vector<16x128xf32> to vector<1x1x16x128xf32>
      tpu.vector_store %arg4[%c0_75, %86, %c0_76, %c0_77], %89 {strides = array<i32>} : memref<1x8x16x128xf32, #tpu.memory_space<vmem>>, vector<1x1x16x128xf32>,
      %c16_i32 = arith.constant 16 : i32
      %90 = arith.cmpi slt, %14, %c16_i32 : i32
      %91 = arith.extui %90 : i1 to i32
      %92 = arith.sitofp %91 : i32 to f32
      %cst_78 = arith.constant dense<0.000000e+00> : vector<128xf32>
      %93 = vector.multi_reduction <add>, %85, %cst_78 [0] : vector<16x128xf32> to vector<128xf32>
      %94 = vector.shape_cast %93 : vector<128xf32> to vector<1x128xf32>
      %95 = vector.broadcast %92 : f32 to vector<1x128xf32>
      %96 = arith.mulf %95, %94 : vector<1x128xf32>
      %97 = arith.addf %arg7, %96 : vector<1x128xf32>
      %98 = arith.mulf %85, %85 : vector<16x128xf32>
      %cst_79 = arith.constant dense<0.000000e+00> : vector<128xf32>
      %99 = vector.multi_reduction <add>, %98, %cst_79 [0] : vector<16x128xf32> to vector<128xf32>
      %100 = vector.shape_cast %99 : vector<128xf32> to vector<1x128xf32>
      %101 = vector.broadcast %92 : f32 to vector<1x128xf32>
      %102 = arith.mulf %101, %100 : vector<1x128xf32>
      %103 = arith.addf %arg8, %102 : vector<1x128xf32>
      scf.yield %97, %103 : vector<1x128xf32>, vector<1x128xf32>
    }
    %c8_i32_1 = arith.constant 8 : i32
    %c0 = arith.constant 0 : index
    %c0_2 = arith.constant 0 : index
    %c0_3 = arith.constant 0 : index
    %c0_4 = arith.constant 0 : index
    %4 = vector.load %arg5[%c0, %c0_2, %c0_3, %c0_4] : memref<1x1x8x128xf32, #tpu.memory_space<vmem>>, vector<1x1x1x128xf32>
    %5 = vector.shape_cast %4 : vector<1x1x1x128xf32> to vector<1x128xf32>
    %6 = vector.shape_cast %3#0 : vector<1x128xf32> to vector<1x1x1x128xf32>
    tpu.vector_store %arg5[%c0, %c0_2, %c0_3, %c0_4], %6 {strides = array<i32>} : memref<1x1x8x128xf32, #tpu.memory_space<vmem>>, vector<1x1x1x128xf32>,
    %c0_5 = arith.constant 0 : index
    %c0_6 = arith.constant 0 : index
    %c1 = arith.constant 1 : index
    %c0_7 = arith.constant 0 : index
    %7 = vector.load %arg5[%c0_5, %c0_6, %c1, %c0_7] : memref<1x1x8x128xf32, #tpu.memory_space<vmem>>, vector<1x1x1x128xf32>
    %8 = vector.shape_cast %7 : vector<1x1x1x128xf32> to vector<1x128xf32>
    %9 = vector.shape_cast %3#1 : vector<1x128xf32> to vector<1x1x1x128xf32>
    tpu.vector_store %arg5[%c0_5, %c0_6, %c1, %c0_7], %9 {strides = array<i32>} : memref<1x1x8x128xf32, #tpu.memory_space<vmem>>, vector<1x1x1x128xf32>,
    %cst_8 = arith.constant 0.000000e+00 : f32
    %10 = vector.broadcast %cst_8 : f32 to vector<6x128xf32>
    %c0_9 = arith.constant 0 : index
    %c0_10 = arith.constant 0 : index
    %c2 = arith.constant 2 : index
    %c0_11 = arith.constant 0 : index
    %11 = vector.load %arg5[%c0_9, %c0_10, %c2, %c0_11] : memref<1x1x8x128xf32, #tpu.memory_space<vmem>>, vector<1x1x6x128xf32>
    %12 = vector.shape_cast %11 : vector<1x1x6x128xf32> to vector<6x128xf32>
    %13 = vector.shape_cast %10 : vector<6x128xf32> to vector<1x1x6x128xf32>
    tpu.vector_store %arg5[%c0_9, %c0_10, %c2, %c0_11], %13 {strides = array<i32>} : memref<1x1x8x128xf32, #tpu.memory_space<vmem>>, vector<1x1x6x128xf32>,
    return
  }
  func.func @transform_0(%arg0: i32, %arg1: i32) -> (i32, i32, i32, i32) {
    %c0_i32 = arith.constant 0 : i32
    %c0_i32_0 = arith.constant 0 : i32
    %c0_i32_1 = arith.constant 0 : i32
    %c0_i32_2 = arith.constant 0 : i32
    return %arg0, %c0_i32, %c0_i32_0, %c0_i32_1 : i32, i32, i32, i32
  }
  func.func @transform_1(%arg0: i32, %arg1: i32) -> (i32, i32, i32) {
    %c0_i32 = arith.constant 0 : i32
    %c0_i32_0 = arith.constant 0 : i32
    %c0_i32_1 = arith.constant 0 : i32
    %c0_i32_2 = arith.constant 0 : i32
    return %c0_i32, %c0_i32_0, %c0_i32_1 : i32, i32, i32
  }
  func.func @transform_2(%arg0: i32, %arg1: i32) -> (i32, i32, i32, i32) {
    %c0_i32 = arith.constant 0 : i32
    %c0_i32_0 = arith.constant 0 : i32
    %c0_i32_1 = arith.constant 0 : i32
    return %arg0, %arg1, %c0_i32, %c0_i32_0 : i32, i32, i32, i32
  }
  func.func @transform_3(%arg0: i32, %arg1: i32) -> (i32, i32, i32, i32) {
    %c0_i32 = arith.constant 0 : i32
    %c0_i32_0 = arith.constant 0 : i32
    %c0_i32_1 = arith.constant 0 : i32
    return %arg0, %arg1, %c0_i32, %c0_i32_0 : i32, i32, i32, i32
  }
}

</mosaic_0001>

<bundles_post_ra>
// kernel: tpu_custom_call.1
= control target key start
LH: loop header
LB: loop body
LE: loop exit
PB: predicated region body
PF: predicated region fallthrough
CT: control target
= control target key end

     0   :  { %s1929_s0 = inlined_call_operand.vmem [shape: f32[2,18,18,4], index: 0, kind: input, shape index: {}]   ;;  %s1930_s1 = inlined_call_operand.vmem [shape: f32[9,4,128], index: 1, kind: input, shape index: {}]   ;;  %s1931_s2 = inlined_call_operand.hbm [shape: f32[2,16,16,128], index: 2, kind: output, shape index: {0}]   ;;  %s1932_s3 = inlined_call_operand.hbm [shape: f32[2,2,8,128], index: 3, kind: output, shape index: {1}]  }
   0x1   :  { %1935 = sst [smem:[#allocation10_spill]] %s1929_s0 }
   0x2   :  { %1936 = sst [smem:[#allocation11_spill]] %s1930_s1 }
   0x3   :  { %1937 = sst [smem:[#allocation12_spill]] %s1931_s2 }
   0x4   :  { %9 = vsyncpa [#allocation3], 0 }
   0x5   :  { %11 = vsyncpa [#allocation3 + $0x1], 0 }
   0x6   :  { %12 = vsyncpa [#allocation5], 0 }
   0x7   :  { %14 = vsyncpa [#allocation5 + $0x1], 0  ;;  %s1640_s12 = smov 0   ;;  %s1642_s13 = smov 0  }
   0x8   :  { %s1644_s14 = smov 0   ;;  %s1646_s15 = smov 0  }
   0x9   :  { %s1648_s16 = smov 0   ;;  %s1650_s17 = smov 0  }
   0xa   :  { %s1652_s18 = smov 0   ;;  %s1654_s19 = smov 0  }
   0xb LB: > { %s1223_s20 = sadd.s32 4294967295, %s1601_s19   ;;  %s1224_s21 = sadd.s32 4294967294, %s1601_s19   ;;  %s1601_s19 = sphi %s1654_s19, %s20_s19   ;;  %s1597_s18 = sphi %s1652_s18, %s1955_s18   ;;  %s1593_s17 = sphi %s1650_s17, %s1954_s17   ;;  %s1589_s16 = sphi %s1648_s16, %s1953_s16   ;;  %s1585_s15 = sphi %s1646_s15, %s1952_s15   ;;  %s1581_s14 = sphi %s1644_s14, %s1951_s14   ;;  %s1577_s13 = sphi %s1642_s13, %s1950_s13   ;;  %s1573_s12 = sphi %s1640_s12, %s1949_s12  }
   0xc   : > { %s29_s22 = sadd.s32 1, %s1593_s17  ;;  %s32_s23 = sadd.s32 1, %s1597_s18 }
   0xd   : > { %p30_p0 = scmp.ge.s32.totalorder %s29_s22, 2  ;;  %p98_p1 = scmp.ne.s32.totalorder %s1581_s14, %s1577_s13 }
   0xe   : > { %p99_p2 = scmp.eq.s32.totalorder %s1223_s20, 3  ;;  %p104_p5 = scmp.ne.s32.totalorder %s1577_s13, %s1573_s12 }
   0xf   : > { %s1957_s22 = smov (%p30_p0, %s29_s22), 0  ;;  %s1959_s23 = smov (!%p30_p0, %s32_s23), %s1597_s18 }
  0x10   : > { %1938 = sst [smem:[#allocation8_spill]] %s1957_s22  ;;  %s84_s24 = ssub.s32 %s1593_s17, %s1957_s22 }
  0x11   : > { %p1691_p3 = por %p99_p2, %p98_p1  ;;  %p34_p4 = scmp.ge.s32.totalorder %s1959_s23, 2 }
  0x12   : > { %p105_p6 = scmp.eq.s32.totalorder %s1224_s21, 3  ;;  %p1227_p7 = scmp.ge.s32.totalorder %s1601_s19, 1 }
  0x13   : > { %s1961_s23 = smov (%p34_p4, %s1959_s23), 0  ;;  %p162_p9 = scmp.lt.s32.totalorder %s1601_s19, 5 }
  0x14   : > { %1940 = sst [smem:[#allocation9_spill]] %s1961_s23  ;;  %p1700_p8 = por %p105_p6, %p104_p5 }
  0x15   : > { %s83_s27 = ssub.s32 %s1597_s18, %s1961_s23  ;;  %s88_s28 = sadd.s32 1, %s1581_s14 }
  0x16   : > { %s85_s29 = sor.u32 %s84_s24, %s83_s27  ;;  %p163_p10 = pnand %p1227_p7, %p162_p9 }
  0x17   : > { %p86_p11 = scmp.eq.s32.totalorder %s85_s29, 0  ;;  %s1712_s4 = sand.u32 (!%p163_p10), 1, %s1577_s13  }
  0x18   : > { %166 = sbr.rel (%p163_p10) target bundleno = 317 (0x13d), region = 28  ;;  %p191_p12 = scmp.lt.s32.totalorder (!%p163_p10), %s1589_s16, 1 }
  0x19   : > { %s1709_s30 = scalar_select %p86_p11, %s1581_s14, %s88_s28  }
  0x1a   : > { %s1228_s5 = sshll.u32 (!%p163_p10), %s1712_s4, 7  ;;  %s1229_s6 = sshll.u32 (!%p163_p10), %s1712_s4, 3 }
  0x1b   : > { %s1231_s8 = sshll.u32 (!%p163_p10), %s1585_s15, 3  ;;  %s1942_s0 = sld [smem:[#allocation10_spill]] (!%p163_p10) }
  0x1c   : > { %s1724_s21 = scalar_lea.vmem (!%p163_p10), [#allocation2], %s1228_s5  ;;  %s1726_s24 = scalar_lea.vmem (!%p163_p10), [#allocation4], %s1229_s6 }
  0x1d   : > { %s192_s7 = scalar_select %p191_p12, %s1589_s16, 1  ;;  %v1728_v0 = vmov 0.0   ;;  %v1730_v1 = vmov 0.0  }
  0x1e   : > { %s1732_s27 = smov 0  }
  0x1f   : > { %s1363_s9 = smul.u32 432, %s192_s7 }
  0x21   : > { %s1722_s20 = scalar_lea.vmem %s1942_s0, %s1363_s9 }
  0x22 LB: >> { %s1943_s1 = sld [smem:[#allocation11_spill]]  ;;  %vm225_vm0 = vcmask 1043456   ;;  %s1761_s28 = sadd.s32 %s1613_s27, %s1231_s8  ;;  %vm218_vm1 = vcmask 31744   ;;  %s1613_s27 = sphi %s1732_s27, %s203_s27   ;;  %v1609_v1 = vphi %v1730_v1, %v1945_v1   ;;  %v1605_v0 = vphi %v1728_v0, %v1944_v0  }
  0x23   : >> { %p207_p13 = scmp.lt.s32.totalorder %s1761_s28, 15  ;;  %p1028_p0 = scmp.lt.s32.totalorder %s1761_s28, 16 }
  0x25   : >> { %s208_s29 = scalar_select %p207_p13, %s1761_s28, 15 }
  0x27   : >> { %s209_s5 = smul.u32 24, %s208_s29 }
  0x28   : >> { %v1232_v2 = vld [vmem:[%s1943_s1 + $0x4] sm:$0xf]  ;;  %v213_v3 = vld [vmem:[%s1943_s1] sm:$0xf]  ;;  %v1239_v4 = vld [vmem:[%s1943_s1 + $0x8] sm:$0xf] }
  0x29   : >> { %1318 = vmatprep.subr.msk.mxu0 %vm225_vm0, %v1232_v2  ;;  %1323 = vmatprep.subr.msk.mxu1 %vm225_vm0, %v213_v3  ;;  %v1245_v5 = vld [vmem:[%s1943_s1 + $0xc] sm:$0xf]  ;;  %s1769_s6 = scalar_lea.vmem %s1722_s20, %s209_s5  ;;  %v1251_v12 = vld [vmem:[%s1943_s1 + $0x10] sm:$0xf]  ;;  %v1257_v13 = vld [vmem:[%s1943_s1 + $0x14] sm:$0xf] }
  0x2a   : >> { %1319 = vmatpush3.msk.msra.mxu0 %vm225_vm0, %v1232_v2  ;;  %1324 = vmatpush3.msk.msra.mxu1 %vm225_vm0, %v213_v3  ;;  %v214_v6 = vld [vmem:[%s1769_s6 + $0x1] sm:$0xff]  ;;  %v215_v8 = vld [vmem:[%s1769_s6 + $0x9] sm:$0xff]  ;;  %v1243_v11 = vld [vmem:[%s1769_s6 + $0x18] sm:$0xff]  ;;  %s1029_s5 = scalar_select %p1028_p0, 1, 0 }
  0x2b   : >> { %1328 = vmatprep.subr.msk.mxu0 %vm225_vm0, %v1239_v4  ;;  %1333 = vmatprep.subr.msk.mxu1 %vm225_vm0, %v1245_v5  ;;  %v211_v7 = vld [vmem:[%s1769_s6] sm:$0xff]  ;;  %v212_v9 = vld [vmem:[%s1769_s6 + $0x8] sm:$0xff]  ;;  %v1263_v18 = vld [vmem:[%s1943_s1 + $0x18] sm:$0xf] }
  0x2c   : >> { %1320 = vmatprep.mubr.msk.f32.mxu0 %vm218_vm1, %v214_v6  ;;  %1325 = vmatprep.mubr.msk.f32.mxu1 %vm218_vm1, %v211_v7  ;;  %v388_v10 = vld [vmem:[%s1769_s6 + $0x2] sm:$0xff]  ;;  %v389_v14 = vld [vmem:[%s1769_s6 + $0xa] sm:$0xff]  ;;  %v1249_v16 = vld [vmem:[%s1769_s6 + $0x19] sm:$0xff]  ;;  %s1030_s7 = scvt.s32.f32 %s1029_s5 }
  0x2d   : >> { %1321 = vmatmul.mubr.msk.f32.vlgmr.msra.gmra.mxu0 %vm218_vm1, %v215_v8  ;;  %1326 = vmatmul.mubr.msk.f32.vlgmr.msra.gmra.mxu1 %vm218_vm1, %v212_v9  ;;  %v1244_v15 = vld [vmem:[%s1769_s6 + $0x20] sm:$0xff]  ;;  %v1269_v19 = vld [vmem:[%s1943_s1 + $0x1c] sm:$0xf]  ;;  %v1261_v22 = vld [vmem:[%s1769_s6 + $0x30] sm:$0xff] }
  0x2e   : >> { %1329 = vmatpush3.msk.msra.mxu0 %vm225_vm0, %v1239_v4  ;;  %1334 = vmatpush3.msk.msra.mxu1 %vm225_vm0, %v1245_v5  ;;  %v1255_v17 = vld [vmem:[%s1769_s6 + $0x1a] sm:$0xff]  ;;  %v1256_v21 = vld [vmem:[%s1769_s6 + $0x22] sm:$0xff]  ;;  %v1267_v23 = vld [vmem:[%s1769_s6 + $0x31] sm:$0xff] }
  0x2f   : >> { %1330 = vmatprep.mubr.msk.f32.mxu0 %vm218_vm1, %v388_v10  ;;  %1335 = vmatprep.mubr.msk.f32.mxu1 %vm218_vm1, %v1243_v11  ;;  %v1250_v20 = vld [vmem:[%s1769_s6 + $0x21] sm:$0xff]  ;;  %v1262_v25 = vld [vmem:[%s1769_s6 + $0x38] sm:$0xff] }
  0x30   : >> { %1338 = vmatprep.subr.msk.mxu0 %vm225_vm0, %v1251_v12  ;;  %1343 = vmatprep.subr.msk.mxu1 %vm225_vm0, %v1257_v13  ;;  %v1275_v24 = vld [vmem:[%s1943_s1 + $0x20] sm:$0xf]  ;;  %v1273_v27 = vld [vmem:[%s1769_s6 + $0x32] sm:$0xff] }
  0x31   : >> { %1331 = vmatmul.mubr.msk.f32.vlgmr.msra.gmra.mxu0 %vm218_vm1, %v389_v14  ;;  %1336 = vmatmul.mubr.msk.f32.vlgmr.msra.gmra.mxu1 %vm218_vm1, %v1244_v15  ;;  %v1268_v26 = vld [vmem:[%s1769_s6 + $0x39] sm:$0xff]  ;;  %v1038_v14 = vstv %s1030_s7 }
  0x32   : >> { %1339 = vmatpush3.msk.msra.mxu0 %vm225_vm0, %v1251_v12  ;;  %1344 = vmatpush3.msk.msra.mxu1 %vm225_vm0, %v1257_v13  ;;  %v1274_v28 = vld [vmem:[%s1769_s6 + $0x3a] sm:$0xff]  ;;  %s1279_s6 = sshll.u32 %s1613_s27, 4  ;;  %s203_s27 = sadd.s32 1, %s1613_s27  }
  0x33   : >> { %1340 = vmatprep.mubr.msk.f32.mxu0 %vm218_vm1, %v1249_v16  ;;  %1345 = vmatprep.mubr.msk.f32.mxu1 %vm218_vm1, %v1255_v17  ;;  %s1025_s29 = scalar_lea.vmem %s1724_s21, %s1279_s6 [#allocation2]  ;;  %p200_p1 = scmp.ge.s32.totalorder %s203_s27, 8  }
  0x34   : >> { %1348 = vmatprep.subr.msk.mxu0 %vm225_vm0, %v1263_v18  ;;  %1353 = vmatprep.subr.msk.mxu1 %vm225_vm0, %v1269_v19  ;;  %s1290_s28 = sshll.u32 (%p200_p1), %s1585_s15, 4  ;;  %s1284_s9 = sshll.u32 (%p200_p1), %s1589_s16, 5 }
  0x35   : >> { %1341 = vmatmul.mubr.msk.f32.vlgmr.msra.gmra.mxu0 %vm218_vm1, %v1250_v20  ;;  %1346 = vmatmul.mubr.msk.f32.vlgmr.msra.gmra.mxu1 %vm218_vm1, %v1256_v21  ;;  %s1077_s10 = sshll.u32 (%p200_p1), %s1724_s21, 4  ;;  %s1074_s11 = sadd.s32 (%p200_p1), %s1290_s28, %s1284_s9  ;;  %s1852_s10 = int_to_ptr.vmem [resolvable:$true] %s1077_s10 }
  0x36   : >> { %1349 = vmatpush3.msk.msra.mxu0 %vm225_vm0, %v1263_v18  ;;  %1354 = vmatpush3.msk.msra.mxu1 %vm225_vm0, %v1269_v19  ;;  %s1285_s8 = sshll.u32 (%p200_p1), %s1074_s11, 7  ;;  %s1946_s2 = sld [smem:[#allocation12_spill]] (%p200_p1) }
  0x37   : >> { %1350 = vmatprep.mubr.msk.f32.mxu0 %vm218_vm1, %v1261_v22  ;;  %1355 = vmatprep.mubr.msk.f32.mxu1 %vm218_vm1, %v1267_v23  ;;  %s1467_s5 = scalar_lea.vmem (%p200_p1), %s1852_s10, 2048  ;;  %s1616_s7 = smov (%p200_p1), [#allocation2]  }
  0x38   : >> { %1358 = vmatprep.subr.msk.mxu0 %vm225_vm0, %v1275_v24  ;;  %p1468_p2 = scmp.ne.s32.totalorder (%p200_p1), %s1852_s10, %s1467_s5  ;;  %s1471_s21 = sshll.u32 (%p200_p1), %s1616_s7, 4  ;;  %s1472_s21 = int_to_ptr.vmem [resolvable:$false] %s1471_s21 }
  0x39   : >> { %1351 = vmatmul.mubr.msk.f32.vlgmr.msra.gmra.mxu0 %vm218_vm1, %v1262_v25  ;;  %1356 = vmatmul.mubr.msk.f32.vlgmr.msra.gmra.mxu1 %vm218_vm1, %v1268_v26  ;;  %s1473_s28 = scalar_lea.vmem (%p200_p1), %s1472_s21, 4096  ;;  %p1474_p6 = scmp.lt.s32.totalorder (%p200_p1), %s1852_s10, %s1472_s21 }
  0x3a   : >> { %1359 = vmatpush3.msk.msra.mxu0 %vm225_vm0, %v1275_v24  ;;  %1360 = vmatprep.mubr.msk.f32.mxu0 %vm218_vm1, %v1273_v27  ;;  %p1469_p4 = pnand (%p200_p1), %p1468_p2, %p1691_p3  ;;  %p1475_p7 = scmp.lt.s32.totalorder (%p200_p1), %s1473_s28, %s1467_s5 }
  0x3c   : > { %s1857_s6 = scalar_lea.hbm (%p200_p1), %s1946_s2, %s1285_s8  ;;  %p1470_p5 = pneg (%p200_p1), %p1469_p4 }
  0x3d   : >> { %1361 = vmatmul.mubr.msk.f32.vlgmr.msra.gmra.mxu0 %vm218_vm1, %v1274_v28  ;;  %p1476_p9 = por (%p200_p1), %p1475_p7, %p1474_p6 }
  0x3f   : > { %p1477_p10 = pnand (%p200_p1), %p1476_p9, %p1470_p5 }
  0xed   : >> { %v1322_v29 = vpop.f32.mrf.mxu0  ;;  %v1327_v30 = vpop.f32.mrf.mxu1 }
  0xee   : >> { %v385_v33 = vadd.f32 %v1327_v30, %v1322_v29 }
  0xef   : >> { %v295_v31 = vpop.f32.mrf.mxu0  ;;  %v379_v32 = vpop.f32.mrf.mxu1 }
  0xf0   : >> { %v380_v36 = vadd.f32 %v379_v32, %v295_v31 }
  0xf1   : >> { %v1332_v34 = vpop.f32.mrf.mxu0  ;;  %v1337_v35 = vpop.f32.mrf.mxu1 }
  0xf2   : >> { %v477_v37 = vadd.f32 %v1332_v34, %v385_v33 }
  0xf3   : >> { %v467_v38 = vpop.f32.mrf.mxu0  ;;  %v560_v39 = vpop.f32.mrf.mxu1 }
  0xf4   : >> { %v570_v40 = vadd.f32 %v1337_v35, %v477_v37  ;;  %v476_v41 = vadd.f32 %v467_v38, %v380_v36 }
  0xf5   : >> { %v1342_v42 = vpop.f32.mrf.mxu0  ;;  %v1347_v43 = vpop.f32.mrf.mxu1 }
  0xf6   : >> { %v569_v44 = vadd.f32 %v560_v39, %v476_v41  ;;  %v660_v45 = vadd.f32 %v1342_v42, %v570_v40 }
  0xf7   : >> { %v650_v46 = vpop.f32.mrf.mxu0  ;;  %v740_v47 = vpop.f32.mrf.mxu1 }
  0xf8   : >> { %v750_v48 = vadd.f32 %v1347_v43, %v660_v45  ;;  %v659_v49 = vadd.f32 %v650_v46, %v569_v44 }
  0xf9   : >> { %v1352_v50 = vpop.f32.mrf.mxu0  ;;  %v1357_v51 = vpop.f32.mrf.mxu1 }
  0xfa   : >> { %v749_v52 = vadd.f32 %v740_v47, %v659_v49  ;;  %v843_v53 = vadd.f32 %v1352_v50, %v750_v48 }
  0xfb   : >> { %v833_v54 = vpop.f32.mrf.mxu0  ;;  %v923_v57 = vpop.f32.mrf.mxu1 }
  0xfc   : >> { %v933_v55 = vadd.f32 %v1357_v51, %v843_v53  ;;  %v842_v56 = vadd.f32 %v833_v54, %v749_v52 }
  0xfd   : >> { %v1362_v58 = vpop.f32.mrf.mxu0 }
  0xfe   : >> { %v932_v59 = vadd.f32 %v923_v57, %v842_v56  ;;  %v1023_v60 = vadd.f32 %v1362_v58, %v933_v55 }
  0xff   : >> { %v1013_v61 = vpop.f32.mrf.mxu0 }
 0x100   : >> { %1027 = vst [vmem:[%s1025_s29 + $0x8] sm:$0xff] %v1023_v60  ;;  %v1022_v62 = vadd.f32 %v1013_v61, %v932_v59  ;;  %v1042_v63 = vmul.f32 %v1023_v60, %v1023_v60 }
 0x102   : >> { %1026 = vst [vmem:[%s1025_s29] sm:$0xff] %v1022_v62  ;;  %v1031_v2 = vadd.f32 %v1023_v60, %v1022_v62  ;;  %v1041_v3 = vmul.f32 %v1022_v62, %v1022_v62  ;;  %s1056_s29 = scalar_lea.sflag (%p200_p1), [#allocation3], %s1712_s4 }
 0x104   : >> { %v1032_v4 = vrot.slane %v1031_v2, 4  ;;  %v1043_v5 = vadd.f32 %v1042_v63, %v1041_v3 }
 0x106   : >> { %v1033_v6 = vadd.f32 %v1032_v4, %v1031_v2  ;;  %v1044_v7 = vrot.slane %v1043_v5, 4 }
 0x108   : >> { %v1034_v8 = vrot.slane %v1033_v6, 2  ;;  %v1045_v9 = vadd.f32 %v1044_v7, %v1043_v5 }
 0x10a   : >> { %v1035_v10 = vadd.f32 %v1034_v8, %v1033_v6  ;;  %v1046_v11 = vrot.slane %v1045_v9, 2 }
 0x10c   : >> { %v1036_v12 = vrot.slane %v1035_v10, 1  ;;  %v1047_v13 = vadd.f32 %v1046_v11, %v1045_v9 }
 0x10e   : >> { %v1037_v15 = vadd.f32 %v1036_v12, %v1035_v10  ;;  %v1048_v16 = vrot.slane %v1047_v13, 1 }
 0x110   : >> { %v1039_v17 = vmul.f32 %v1038_v14, %v1037_v15  ;;  %v1049_v18 = vadd.f32 %v1048_v16, %v1047_v13 }
 0x112   : >> { %v1040_v19 = vadd.f32 %v1609_v1, %v1039_v17   ;;  %v1050_v20 = vmul.f32 %v1049_v18, %v1038_v14  ;;  %202 = sbr.rel (!%p200_p1) target bundleno = 34 (0x22), region = 99 }
 0x114   : >> { %v1051_v21 = vadd.f32 %v1605_v0, %v1050_v20   ;;  %v1945_v1 = vmov %v1040_v19  ;;  %1052 = vst [vmem:[%s1726_s24] sm:$0x1] (%p200_p1), %v1040_v19 }
 0x115   : > { %v1615_v1 = vmov (%p200_p1), 0.0  }
 0x116   : >> { %v1944_v0 = vmov %v1051_v21  ;;  %1053 = vst [vmem:[%s1726_s24 + $0x1] sm:$0x1] (%p200_p1), %v1051_v21  ;;  %1054 = vst [vmem:[%s1726_s24 + $0x2] sm:$0x3f] (%p200_p1), %v1615_v1 }
 0x117   : > { %1480 = shalt.err (!%p1477_p10)
}
 0x118   : > { %s1481_s9 = scalar_lea.hbm %s1857_s6, 2048  ;;  %s1485_s20 = scalar_lea.hbm %s1946_s2, 8192 }
 0x119   : > { %p1482_p11 = scmp.ne.s32.totalorder %s1857_s6, %s1481_s9  ;;  %p1486_p0 = scmp.lt.s32.totalorder %s1857_s6, %s1946_s2 }
 0x11a   : > { %p1487_p1 = scmp.lt.s32.totalorder %s1485_s20, %s1481_s9 }
 0x11b   : > { %p1483_p12 = pnand %p1482_p11, %p1691_p3 }
 0x11c   : > { %p1488_p2 = por %p1487_p1, %p1486_p0 }
 0x11d   : > { %p1484_p13 = pneg %p1483_p12 }
 0x11f   : > { %p1489_p4 = pnand %p1488_p2, %p1484_p13 }
 0x121   : > { %1492 = shalt.err (!%p1489_p4)
}
 0x122   : > { %s1617_s5 = smov 128   ;;  %s1618_s21 = smov 8  }
 0x123   : > { %1364 = dma.vmem_to_hbm [thread:$0]  (%p1691_p3), %s1852_s10, 2048, %s1857_s6, %s1056_s29, %s1617_s5, %s1617_s5, %s1618_s21  }
 0x124   : > { %s1286_s28 = sshll.u32 %s1589_s16, 1  ;;  %s1095_s9 = sshll.u32 %s1726_s24, 4  ;;  %s1096_s9 = int_to_ptr.vmem [resolvable:$true] %s1095_s9 }
 0x125   : > { %s1091_s11 = sadd.s32 %s1585_s15, %s1286_s28  ;;  %s1061_s0 = scalar_lea.sflag [#allocation5], %s1712_s4 }
 0x126   : > { %s1287_s8 = sshll.u32 %s1091_s11, 7  ;;  %s1493_s1 = scalar_lea.vmem %s1096_s9, 128 }
 0x127   : > { %s1093_s7 = scalar_lea.hbm %s1932_s3, %s1287_s8  ;;  %p1494_p5 = scmp.ne.s32.totalorder %s1096_s9, %s1493_s1 }
 0x128   : > { %s1619_s2 = smov [#allocation4]  }
 0x129   : > { %p1495_p6 = pnand %p1494_p5, %p1691_p3  ;;  %s1497_s23 = sshll.u32 %s1619_s2, 4  ;;  %s1498_s23 = int_to_ptr.vmem [resolvable:$false] %s1497_s23 }
 0x12a   : > { %s1499_s22 = scalar_lea.vmem %s1498_s23, 256  ;;  %p1500_p9 = scmp.lt.s32.totalorder %s1096_s9, %s1498_s23 }
 0x12b   : > { %p1496_p7 = pneg %p1495_p6  ;;  %p1501_p10 = scmp.lt.s32.totalorder %s1499_s22, %s1493_s1 }
 0x12d   : > { %p1502_p11 = por %p1501_p10, %p1500_p9 }
 0x12f   : > { %p1503_p12 = pnand %p1502_p11, %p1496_p7 }
 0x131   : > { %1506 = shalt.err (!%p1503_p12)
}
 0x132   : > { %s1507_s15 = scalar_lea.hbm %s1093_s7, 128  ;;  %s1511_s24 = scalar_lea.hbm %s1932_s3, 512 }
 0x133   : > { %p1508_p13 = scmp.ne.s32.totalorder %s1093_s7, %s1507_s15  ;;  %p1512_p2 = scmp.lt.s32.totalorder %s1093_s7, %s1932_s3 }
 0x134   : > { %p1513_p4 = scmp.lt.s32.totalorder %s1511_s24, %s1507_s15 }
 0x135   : > { %p1509_p0 = pnand %p1508_p13, %p1691_p3 }
 0x136   : > { %p1514_p5 = por %p1513_p4, %p1512_p2 }
 0x137   : > { %p1510_p1 = pneg %p1509_p0 }
 0x139   : > { %p1515_p6 = pnand %p1514_p5, %p1510_p1 }
 0x13b   : > { %1518 = shalt.err (!%p1515_p6)
}
 0x13c   : > { %1365 = dma.vmem_to_hbm [thread:$0]  (%p1691_p3), %s1096_s9, 128, %s1093_s7, %s1061_s0  }
 0x13d PF: > { %p1375_p7 = scmp.ge.s32.totalorder %s1601_s19, 2  ;;  %s1107_s1 = sand.u32 1, %s1573_s12  }
 0x13e   : > { %s1108_s2 = scalar_lea.sflag [#allocation3], %s1107_s1 }
 0x13f   : > { %p1369_p9 = pnand %p1375_p7, %p1700_p8 }
 0x141   : > { %p1370_p10 = pneg %p1369_p9 }
 0x143   : > { %1564 = dma.done.wait (%p1370_p10), %s1108_s2, 2048  }
 0x144   : > { %1566 = vsyncadd (%p1370_p10), %s1108_s2, 4294965248  ;;  %s1117_s22 = scalar_lea.sflag [#allocation5], %s1107_s1 }
 0x145   : > { %1568 = dma.done.wait (%p1370_p10), %s1117_s22, 128  }
 0x146   : > { %1570 = vsyncadd (%p1370_p10), %s1117_s22, 4294967168  ;;  %s20_s19 = sadd.s32 1, %s1601_s19   ;;  %s1947_s0 = sld [smem:[#allocation8_spill]] }
 0x147   : > { %p17_p11 = scmp.ge.s32.totalorder %s20_s19, 6   ;;  %s1948_s23 = sld [smem:[#allocation9_spill]] }
 0x148   : > { %s1949_s12 = smov %s1577_s13  ;;  %s1950_s13 = smov %s1581_s14 }
 0x149   : > { %s1951_s14 = smov %s1709_s30  ;;  %s1952_s15 = smov %s1593_s17 }
 0x14a   : > { %s1953_s16 = smov %s1597_s18  ;;  %19 = sbr.rel (!%p17_p11) target bundleno = 11 (0xb), region = 110 }
 0x14c   : > { %s1954_s17 = smov %s1947_s0 }
 0x14d   : > { %s1955_s18 = smov %s1948_s23 }
 0x14f   :  { %1122 = vsyncpa [#allocation3], 1 }
 0x150   :  { %1124 = vsyncpa [#allocation3 + $0x1], 1 }
 0x151   :  { %1125 = vsyncpa [#allocation5], 1 }
 0x152   :  { %1127 = vsyncpa [#allocation5 + $0x1], 1 }

</bundles_post_ra>
